<compile_context>
chip_gen: v7x
topology: tpu7x:2x2x1
jax: 0.10.0
libtpu: 0.0.40
codegen_flags: <defaults>
</compile_context>

<pallas_src>
import functools

import jax
import jax.numpy as jnp
from jax.experimental import pallas as pl
from jax.experimental.pallas import tpu as pltpu


def _pick_tile_n(c, hw, target_bytes=2 << 20, max_bytes=6 << 20):
    """Pixel (lane) tile width: multiple of 128, sized so the (C, tile_n) f32
    working-set block is ~target_bytes (no artificial lane cap)."""
    t = max(1, target_bytes // (c * 4))
    t = max(128, (t // 128) * 128)
    while t > 128 and c * t * 4 > max_bytes:
        t -= 128
    # no point making the tile wider than the (128-rounded) pixel count
    t = min(t, max(128, pl.cdiv(hw, 128) * 128))
    return t


def _ce2d_kernel(logits_ref, target_ref, sum_ref, cnt_ref,
                 sum_acc_ref, cnt_acc_ref, *,
                 ignore_index, n_pix, tile_n, n_inner, exp_in_bf16):
    """Grid = (batch, outer_tile_group, inner_tile). One step consumes a
    (C, TN) logits tile and a (1, TN) target tile."""
    i = pl.program_id(2)                          # inner pixel-tile axis ("arbitrary")
    t = pl.program_id(1) * n_inner + i            # global pixel-tile index
    tile_start = t * tile_n

    # init per-lane accumulators at the start of each (batch, outer) sweep
    @pl.when(i == 0)
    def _():
        sum_acc_ref[...] = jnp.zeros_like(sum_acc_ref)
        cnt_acc_ref[...] = jnp.zeros_like(cnt_acc_ref)

    x = logits_ref[...].astype(jnp.float32)       # (C, TN) — f32 math inside
    tgt = target_ref[...]                         # (1, TN) int32

    # numerically-stable log-softmax over the class (sublane) axis
    m = jnp.max(x, axis=0, keepdims=True)         # (1, TN)
    shifted = x - m                               # (C, TN)
    if exp_in_bf16:
        # bf16 EUP exp (v6e/v7x only); accumulate the class sum in f32
        p = jnp.exp(shifted.astype(jnp.bfloat16)).astype(jnp.float32)
    else:
        p = jnp.exp(shifted)
    lse = jnp.log(jnp.sum(p, axis=0, keepdims=True))          # (1, TN)

    # gather the target-class *shifted* logit: (C, 1) iota broadcast against
    # the (1, TN) targets (no full (C, TN) int32 iota materialized)
    cls_ids = jax.lax.broadcasted_iota(jnp.int32, (shifted.shape[0], 1), 0)
    tgt_shifted = jnp.sum(jnp.where(cls_ids == tgt, shifted, 0.0),
                          axis=0, keepdims=True)               # (1, TN)

    loss_lane = lse - tgt_shifted                              # (1, TN)
    valid_ign = tgt != ignore_index                            # (1, TN)

    # Fast path: tile lies fully inside the real pixel range — no column mask.
    @pl.when(tile_start + tile_n <= n_pix)
    def _():
        sum_acc_ref[...] += jnp.where(valid_ign, loss_lane, 0.0)
        cnt_acc_ref[...] += valid_ign.astype(jnp.float32)

    # Slow path: ragged tail (and any fully-out-of-range clamped tiles).
    @pl.when(tile_start + tile_n > n_pix)
    def _():
        col = tile_start + jax.lax.broadcasted_iota(jnp.int32, valid_ign.shape, 1)
        valid = valid_ign & (col < n_pix)
        sum_acc_ref[...] += jnp.where(valid, loss_lane, 0.0)
        cnt_acc_ref[...] += valid.astype(jnp.float32)

    # single cross-lane reduce + (1,1) store only at the end of the sweep
    @pl.when(i == pl.num_programs(2) - 1)
    def _():
        sum_ref[...] = jnp.sum(sum_acc_ref[...], keepdims=True)
        cnt_ref[...] = jnp.sum(cnt_acc_ref[...], keepdims=True)


def cross_entropy_2d(output, target, *, ignore_index, reduction="mean",
                     resize_scores=True, tile_n=None,
                     compute_dtype=jnp.bfloat16, exp_in_bf16=False):
    """output: (b, c, h, w) float logits; target: (b, th, tw) int.

    Matches CrossEntropy2D.forward with weight=None on the resize_scores path.
    compute_dtype: dtype in which the (possibly resized) logits are streamed to
      the kernel (default bf16 — halves HBM traffic; small numerics change).
      Pass None to keep the input dtype.
    """
    b, c, h, w = output.shape
    tb, th, tw = target.shape
    assert b == tb

    # Cast BEFORE the resize so no f32 hi-res intermediate is materialized.
    if compute_dtype is not None and output.dtype != compute_dtype:
        output = output.astype(compute_dtype)

    if resize_scores and (h != th or w != tw):
        # bilinear, align_corners=False (half-pixel centers) == jax.image default
        output = jax.image.resize(output, (b, c, th, tw), method="bilinear")
        h, w = th, tw

    hw = h * w
    # Free, contiguous reshapes: NO transpose, NO pad — batch handled by the grid.
    logits = output.reshape(b, c, hw)
    if target.dtype != jnp.int32:
        target = target.astype(jnp.int32)
    tgt = target.reshape(b, 1, hw)

    if tile_n is None:
        tile_n = _pick_tile_n(c, hw)
    assert tile_n % 128 == 0
    n_tiles = pl.cdiv(hw, tile_n)
    # Second parallel axis over pixel-tile groups: keeps both v7x TensorCores
    # busy even at b == 1; harmless on single-TC v5e/v6e.
    n_outer = 2 if n_tiles >= 2 else 1
    n_inner = pl.cdiv(n_tiles, n_outer)

    kernel = functools.partial(_ce2d_kernel, ignore_index=ignore_index,
                               n_pix=hw, tile_n=tile_n, n_inner=n_inner,
                               exp_in_bf16=exp_in_bf16)

    # Pixel-tile index, clamped so over-hanging (fully masked) grid steps never
    # index a block past the end of the array.
    def _pix_idx(bi, o, i):
        return jnp.minimum(o * n_inner + i, n_tiles - 1)

    # VMEM budget: 2x double-buffered input blocks + the live (C, TN) f32
    # temporaries (x, shifted, exp, one-hot select, ...) + scratch + headroom.
    # Capped at 48 MiB so it fits v7x's 64 MiB physical VMEM (fine on v5e/v6e).
    itemsize = jnp.dtype(logits.dtype).itemsize
    in_block = c * tile_n * itemsize
    tgt_block = tile_n * 4
    f32_block = c * tile_n * 4
    scratch_bytes = 2 * tile_n * 4
    vmem_limit = 2 * (in_block + tgt_block) + 6 * f32_block + scratch_bytes + (4 << 20)
    vmem_limit = int(min(48 << 20, max(24 << 20, vmem_limit)))

    sum_bo, cnt_bo = pl.pallas_call(
        kernel,
        out_shape=(jax.ShapeDtypeStruct((b, n_outer, 1, 1), jnp.float32),
                   jax.ShapeDtypeStruct((b, n_outer, 1, 1), jnp.float32)),
        grid_spec=pltpu.PrefetchScalarGridSpec(
            num_scalar_prefetch=0,
            grid=(b, n_outer, n_inner),
            in_specs=[
                pl.BlockSpec((pl.Squeezed(), c, tile_n),
                             lambda bi, o, i: (bi, 0, _pix_idx(bi, o, i))),
                pl.BlockSpec((pl.Squeezed(), 1, tile_n),
                             lambda bi, o, i: (bi, 0, _pix_idx(bi, o, i))),
            ],
            out_specs=[
                pl.BlockSpec((pl.Squeezed(), pl.Squeezed(), 1, 1),
                             lambda bi, o, i: (bi, o, 0, 0)),
                pl.BlockSpec((pl.Squeezed(), pl.Squeezed(), 1, 1),
                             lambda bi, o, i: (bi, o, 0, 0)),
            ],
            scratch_shapes=[pltpu.VMEM((1, tile_n), jnp.float32),
                            pltpu.VMEM((1, tile_n), jnp.float32)],
        ),
        compiler_params=pltpu.CompilerParams(
            dimension_semantics=("parallel", "parallel", "arbitrary"),
            vmem_limit_bytes=vmem_limit),
    )(logits, tgt)

    loss_sum = jnp.sum(sum_bo)
    valid_cnt = jnp.sum(cnt_bo)

    if reduction == "mean":
        # NOTE: zero valid pixels -> NaN (same as torch).
        return loss_sum / valid_cnt
    elif reduction == "sum":
        return loss_sum
    else:
        raise NotImplementedError("only 'mean' and 'sum' reductions supported")


def _reference_ce2d(output, target, ignore_index, reduction="mean"):
    """Pure-JAX f32 reference mirroring the module (resize_scores path)."""
    b, c, h, w = output.shape
    tb, th, tw = target.shape
    out = output.astype(jnp.float32)
    if h != th or w != tw:
        out = jax.image.resize(out, (b, c, th, tw), method="bilinear")
    logits = out.reshape(b, c, th * tw)
    tgt = target.reshape(b, th * tw)
    logp = jax.nn.log_softmax(logits, axis=1)
    valid = tgt != ignore_index
    safe = jnp.where(valid, tgt, 0)
    picked = jnp.take_along_axis(logp, safe[:, None, :], axis=1)[:, 0, :]
    loss = jnp.where(valid, -picked, 0.0)
    if reduction == "mean":
        return jnp.sum(loss) / jnp.sum(valid)
    return jnp.sum(loss)


if __name__ == "__main__":
    key = jax.random.PRNGKey(0)
    k1, k2, k3, k4, k5, k6, k7, k8 = jax.random.split(key, 8)
    ignore_index = 255

    # --- Test 1: no-resize path, b=2, c=4, 16x16 ---
    b, c, h, w = 2, 4, 16, 16
    out1 = jax.random.normal(k1, (b, c, h, w), dtype=jnp.float32)
    tgt1 = jax.random.randint(k2, (b, h, w), 0, c, jnp.int32)
    tgt1 = jnp.where(jax.random.bernoulli(k3, 0.1, (b, h, w)), ignore_index, tgt1)
    ref1 = jax.block_until_ready(_reference_ce2d(out1, tgt1, ignore_index))

    # f32 end-to-end (bit-faithful path): tight tolerance
    loss_f32 = jax.block_until_ready(
        cross_entropy_2d(out1, tgt1, ignore_index=ignore_index, compute_dtype=None))
    assert jnp.allclose(loss_f32, ref1, rtol=1e-4, atol=1e-4), (loss_f32, ref1)

    # default bf16 ingest: looser tolerance vs the f32 reference
    loss_bf16 = jax.block_until_ready(
        cross_entropy_2d(out1, tgt1, ignore_index=ignore_index))
    assert jnp.allclose(loss_bf16, ref1, rtol=2e-2, atol=2e-2), (loss_bf16, ref1)

    # --- Test 2: bilinear-resize path (8x8 -> 16x16), b=1, C=5 (non-multiple of 8) ---
    b2, c2 = 1, 5
    out2 = jax.random.normal(k4, (b2, c2, 8, 8), dtype=jnp.float32)
    tgt2 = jax.random.randint(k5, (b2, 16, 16), 0, c2, jnp.int32)
    ref2 = jax.block_until_ready(_reference_ce2d(out2, tgt2, ignore_index))
    loss2 = jax.block_until_ready(
        cross_entropy_2d(out2, tgt2, ignore_index=ignore_index))
    assert jnp.allclose(loss2, ref2, rtol=2e-2, atol=2e-2), (loss2, ref2)

    # --- Test 3: ragged pixel tail + multi-tile (outer/inner) grid + 'sum' ---
    b3, c3 = 1, 5
    out3 = jax.random.normal(k6, (b3, c3, 12, 12), dtype=jnp.float32)
    tgt3 = jax.random.randint(k7, (b3, 24, 20), 0, c3, jnp.int32)
    tgt3 = jnp.where(jax.random.bernoulli(k8, 0.1, (b3, 24, 20)), ignore_index, tgt3)
    ref3 = jax.block_until_ready(
        _reference_ce2d(out3, tgt3, ignore_index, reduction="sum"))
    loss3 = jax.block_until_ready(
        cross_entropy_2d(out3, tgt3, ignore_index=ignore_index,
                         reduction="sum", tile_n=128))
    assert jnp.allclose(loss3, ref3, rtol=2e-2, atol=2e-2), (loss3, ref3)

    print("KERNEL_OK")
</pallas_src>

<mosaic_0001>
module attributes {stable_mosaic.version = 11 : i64} {
  func.func @_ce2d_kernel(%arg0: i32, %arg1: i32, %arg2: i32, %arg3: memref<1x4x256xf32, #tpu.memory_space<vmem>>, %arg4: memref<1x1x256xi32, #tpu.memory_space<vmem>>, %arg5: memref<1x1x1x1xf32, #tpu.memory_space<vmem>>, %arg6: memref<1x1x1x1xf32, #tpu.memory_space<vmem>>, %arg7: memref<1x256xf32, #tpu.memory_space<vmem>>, %arg8: memref<1x256xf32, #tpu.memory_space<vmem>>) attributes {dimension_semantics = [#tpu.dimension_semantics<parallel>, #tpu.dimension_semantics<parallel>, #tpu.dimension_semantics<arbitrary>], iteration_bounds = array<i64: 2, 1, 1>, scalar_prefetch = 0 : i64, scratch_operands = 2 : i64, tpu.core_type = #tpu.core_type<tc>, window_params = [{transform_indices = @transform_0, window_bounds = array<i64: 1, 4, 256>}, {transform_indices = @transform_1, window_bounds = array<i64: 1, 1, 256>}, {transform_indices = @transform_2, window_bounds = array<i64: 1, 1, 1, 1>}, {transform_indices = @transform_3, window_bounds = array<i64: 1, 1, 1, 1>}]} {
    %c1_i32 = arith.constant 1 : i32
    %0 = arith.muli %arg1, %c1_i32 : i32
    %1 = arith.addi %0, %arg2 : i32
    %c256_i32 = arith.constant 256 : i32
    %2 = arith.muli %1, %c256_i32 : i32
    %c0_i32 = arith.constant 0 : i32
    %3 = arith.cmpi eq, %arg2, %c0_i32 : i32
    %4 = arith.extui %3 : i1 to i32
    %c0_i32_0 = arith.constant 0 : i32
    %5 = arith.cmpi ne, %4, %c0_i32_0 : i32
    scf.if %5 {
      %cst_17 = arith.constant 0.000000e+00 : f32
      %40 = vector.broadcast %cst_17 : f32 to vector<1x256xf32>
      %c0_18 = arith.constant 0 : index
      %c0_19 = arith.constant 0 : index
      %41 = vector.load %arg7[%c0_18, %c0_19] : memref<1x256xf32, #tpu.memory_space<vmem>>, vector<1x256xf32>
      tpu.vector_store %arg7[%c0_18, %c0_19], %40 {strides = array<i32>} : memref<1x256xf32, #tpu.memory_space<vmem>>, vector<1x256xf32>,
      %cst_20 = arith.constant 0.000000e+00 : f32
      %42 = vector.broadcast %cst_20 : f32 to vector<1x256xf32>
      %c0_21 = arith.constant 0 : index
      %c0_22 = arith.constant 0 : index
      %43 = vector.load %arg8[%c0_21, %c0_22] : memref<1x256xf32, #tpu.memory_space<vmem>>, vector<1x256xf32>
      tpu.vector_store %arg8[%c0_21, %c0_22], %42 {strides = array<i32>} : memref<1x256xf32, #tpu.memory_space<vmem>>, vector<1x256xf32>,
    } else {
    }
    %c0 = arith.constant 0 : index
    %c0_1 = arith.constant 0 : index
    %c0_2 = arith.constant 0 : index
    %6 = vector.load %arg3[%c0, %c0_1, %c0_2] : memref<1x4x256xf32, #tpu.memory_space<vmem>>, vector<1x4x256xf32>
    %7 = vector.shape_cast %6 : vector<1x4x256xf32> to vector<4x256xf32>
    %c0_3 = arith.constant 0 : index
    %c0_4 = arith.constant 0 : index
    %c0_5 = arith.constant 0 : index
    %8 = vector.load %arg4[%c0_3, %c0_4, %c0_5] : memref<1x1x256xi32, #tpu.memory_space<vmem>>, vector<1x1x256xi32>
    %9 = vector.shape_cast %8 : vector<1x1x256xi32> to vector<1x256xi32>
    %cst = arith.constant dense<0xFF800000> : vector<256xf32>
    %10 = vector.multi_reduction <maximumf>, %7, %cst [0] : vector<4x256xf32> to vector<256xf32>
    %11 = vector.shape_cast %10 : vector<256xf32> to vector<1x256xf32>
    %12 = vector.broadcast %11 : vector<1x256xf32> to vector<4x256xf32>
    %13 = arith.subf %7, %12 : vector<4x256xf32>
    %14 = math.exp %13 : vector<4x256xf32>
    %cst_6 = arith.constant dense<0.000000e+00> : vector<256xf32>
    %15 = vector.multi_reduction <add>, %14, %cst_6 [0] : vector<4x256xf32> to vector<256xf32>
    %16 = vector.shape_cast %15 : vector<256xf32> to vector<1x256xf32>
    %17 = math.log %16 : vector<1x256xf32>
    %18 = tpu.iota {dimensions = array<i32: 0>} : vector<4x1xi32>
    %19 = vector.broadcast %18 : vector<4x1xi32> to vector<4x256xi32>
    %20 = vector.broadcast %9 : vector<1x256xi32> to vector<4x256xi32>
    %21 = arith.cmpi eq, %19, %20 : vector<4x256xi32>
    %cst_7 = arith.constant 0.000000e+00 : f32
    %22 = vector.broadcast %cst_7 : f32 to vector<4x256xf32>
    %23 = arith.select %21, %13, %22 : vector<4x256xi1>, vector<4x256xf32>
    %cst_8 = arith.constant dense<0.000000e+00> : vector<256xf32>
    %24 = vector.multi_reduction <add>, %23, %cst_8 [0] : vector<4x256xf32> to vector<256xf32>
    %25 = vector.shape_cast %24 : vector<256xf32> to vector<1x256xf32>
    %26 = arith.subf %17, %25 : vector<1x256xf32>
    %c255_i32 = arith.constant 255 : i32
    %27 = vector.broadcast %c255_i32 : i32 to vector<1x256xi32>
    %28 = arith.cmpi ne, %9, %27 : vector<1x256xi32>
    %c256_i32_9 = arith.constant 256 : i32
    %29 = arith.addi %2, %c256_i32_9 : i32
    %c256_i32_10 = arith.constant 256 : i32
    %30 = arith.cmpi sle, %29, %c256_i32_10 : i32
    %31 = arith.extui %30 : i1 to i32
    %c0_i32_11 = arith.constant 0 : i32
    %32 = arith.cmpi ne, %31, %c0_i32_11 : i32
    scf.if %32 {
      %c0_17 = arith.constant 0 : index
      %c0_18 = arith.constant 0 : index
      %40 = vector.load %arg7[%c0_17, %c0_18] : memref<1x256xf32, #tpu.memory_space<vmem>>, vector<1x256xf32>
      %cst_19 = arith.constant 0.000000e+00 : f32
      %41 = vector.broadcast %cst_19 : f32 to vector<1x256xf32>
      %42 = arith.select %28, %26, %41 : vector<1x256xi1>, vector<1x256xf32>
      %43 = arith.addf %40, %42 : vector<1x256xf32>
      %c0_20 = arith.constant 0 : index
      %c0_21 = arith.constant 0 : index
      %44 = vector.load %arg7[%c0_20, %c0_21] : memref<1x256xf32, #tpu.memory_space<vmem>>, vector<1x256xf32>
      tpu.vector_store %arg7[%c0_20, %c0_21], %43 {strides = array<i32>} : memref<1x256xf32, #tpu.memory_space<vmem>>, vector<1x256xf32>,
      %c0_22 = arith.constant 0 : index
      %c0_23 = arith.constant 0 : index
      %45 = vector.load %arg8[%c0_22, %c0_23] : memref<1x256xf32, #tpu.memory_space<vmem>>, vector<1x256xf32>
      %46 = arith.extui %28 : vector<1x256xi1> to vector<1x256xi32>
      %47 = arith.sitofp %46 : vector<1x256xi32> to vector<1x256xf32>
      %48 = arith.addf %45, %47 : vector<1x256xf32>
      %c0_24 = arith.constant 0 : index
      %c0_25 = arith.constant 0 : index
      %49 = vector.load %arg8[%c0_24, %c0_25] : memref<1x256xf32, #tpu.memory_space<vmem>>, vector<1x256xf32>
      tpu.vector_store %arg8[%c0_24, %c0_25], %48 {strides = array<i32>} : memref<1x256xf32, #tpu.memory_space<vmem>>, vector<1x256xf32>,
    } else {
    }
    %c256_i32_12 = arith.constant 256 : i32
    %33 = arith.addi %2, %c256_i32_12 : i32
    %c256_i32_13 = arith.constant 256 : i32
    %34 = arith.cmpi sgt, %33, %c256_i32_13 : i32
    %35 = arith.extui %34 : i1 to i32
    %c0_i32_14 = arith.constant 0 : i32
    %36 = arith.cmpi ne, %35, %c0_i32_14 : i32
    scf.if %36 {
      %40 = tpu.iota {dimensions = array<i32: 1>} : vector<1x256xi32>
      %41 = vector.broadcast %2 : i32 to vector<1x256xi32>
      %42 = arith.addi %41, %40 : vector<1x256xi32>
      %c256_i32_17 = arith.constant 256 : i32
      %43 = vector.broadcast %c256_i32_17 : i32 to vector<1x256xi32>
      %44 = arith.cmpi slt, %42, %43 : vector<1x256xi32>
      %45 = arith.andi %28, %44 : vector<1x256xi1>
      %c0_18 = arith.constant 0 : index
      %c0_19 = arith.constant 0 : index
      %46 = vector.load %arg7[%c0_18, %c0_19] : memref<1x256xf32, #tpu.memory_space<vmem>>, vector<1x256xf32>
      %cst_20 = arith.constant 0.000000e+00 : f32
      %47 = vector.broadcast %cst_20 : f32 to vector<1x256xf32>
      %48 = arith.select %45, %26, %47 : vector<1x256xi1>, vector<1x256xf32>
      %49 = arith.addf %46, %48 : vector<1x256xf32>
      %c0_21 = arith.constant 0 : index
      %c0_22 = arith.constant 0 : index
      %50 = vector.load %arg7[%c0_21, %c0_22] : memref<1x256xf32, #tpu.memory_space<vmem>>, vector<1x256xf32>
      tpu.vector_store %arg7[%c0_21, %c0_22], %49 {strides = array<i32>} : memref<1x256xf32, #tpu.memory_space<vmem>>, vector<1x256xf32>,
      %c0_23 = arith.constant 0 : index
      %c0_24 = arith.constant 0 : index
      %51 = vector.load %arg8[%c0_23, %c0_24] : memref<1x256xf32, #tpu.memory_space<vmem>>, vector<1x256xf32>
      %52 = arith.extui %45 : vector<1x256xi1> to vector<1x256xi32>
      %53 = arith.sitofp %52 : vector<1x256xi32> to vector<1x256xf32>
      %54 = arith.addf %51, %53 : vector<1x256xf32>
      %c0_25 = arith.constant 0 : index
      %c0_26 = arith.constant 0 : index
      %55 = vector.load %arg8[%c0_25, %c0_26] : memref<1x256xf32, #tpu.memory_space<vmem>>, vector<1x256xf32>
      tpu.vector_store %arg8[%c0_25, %c0_26], %54 {strides = array<i32>} : memref<1x256xf32, #tpu.memory_space<vmem>>, vector<1x256xf32>,
    } else {
    }
    %c0_i32_15 = arith.constant 0 : i32
    %37 = arith.cmpi eq, %arg2, %c0_i32_15 : i32
    %38 = arith.extui %37 : i1 to i32
    %c0_i32_16 = arith.constant 0 : i32
    %39 = arith.cmpi ne, %38, %c0_i32_16 : i32
    scf.if %39 {
      %c0_17 = arith.constant 0 : index
      %c0_18 = arith.constant 0 : index
      %40 = vector.load %arg7[%c0_17, %c0_18] : memref<1x256xf32, #tpu.memory_space<vmem>>, vector<1x256xf32>
      %41 = vector.shape_cast %40 : vector<1x256xf32> to vector<1x1x256xf32>
      %cst_19 = arith.constant dense<0.000000e+00> : vector<1xf32>
      %42 = vector.multi_reduction <add>, %41, %cst_19 [1, 2] : vector<1x1x256xf32> to vector<1xf32>
      %43 = vector.shape_cast %42 : vector<1xf32> to vector<1x1x1xf32>
      %44 = vector.extract %43[0, 0, 0] : f32 from vector<1x1x1xf32>
      %45 = vector.broadcast %44 : f32 to vector<1x1xf32>
      %c0_20 = arith.constant 0 : index
      %c0_21 = arith.constant 0 : index
      %c0_22 = arith.constant 0 : index
      %c0_23 = arith.constant 0 : index
      %46 = vector.load %arg5[%c0_20, %c0_21, %c0_22, %c0_23] : memref<1x1x1x1xf32, #tpu.memory_space<vmem>>, vector<1x1x1x1xf32>
      %47 = vector.shape_cast %46 : vector<1x1x1x1xf32> to vector<1x1xf32>
      %48 = vector.shape_cast %45 : vector<1x1xf32> to vector<1x1x1x1xf32>
      tpu.vector_store %arg5[%c0_20, %c0_21, %c0_22, %c0_23], %48 {strides = array<i32>} : memref<1x1x1x1xf32, #tpu.memory_space<vmem>>, vector<1x1x1x1xf32>,
      %c0_24 = arith.constant 0 : index
      %c0_25 = arith.constant 0 : index
      %49 = vector.load %arg8[%c0_24, %c0_25] : memref<1x256xf32, #tpu.memory_space<vmem>>, vector<1x256xf32>
      %50 = vector.shape_cast %49 : vector<1x256xf32> to vector<1x1x256xf32>
      %cst_26 = arith.constant dense<0.000000e+00> : vector<1xf32>
      %51 = vector.multi_reduction <add>, %50, %cst_26 [1, 2] : vector<1x1x256xf32> to vector<1xf32>
      %52 = vector.shape_cast %51 : vector<1xf32> to vector<1x1x1xf32>
      %53 = vector.extract %52[0, 0, 0] : f32 from vector<1x1x1xf32>
      %54 = vector.broadcast %53 : f32 to vector<1x1xf32>
      %c0_27 = arith.constant 0 : index
      %c0_28 = arith.constant 0 : index
      %c0_29 = arith.constant 0 : index
      %c0_30 = arith.constant 0 : index
      %55 = vector.load %arg6[%c0_27, %c0_28, %c0_29, %c0_30] : memref<1x1x1x1xf32, #tpu.memory_space<vmem>>, vector<1x1x1x1xf32>
      %56 = vector.shape_cast %55 : vector<1x1x1x1xf32> to vector<1x1xf32>
      %57 = vector.shape_cast %54 : vector<1x1xf32> to vector<1x1x1x1xf32>
      tpu.vector_store %arg6[%c0_27, %c0_28, %c0_29, %c0_30], %57 {strides = array<i32>} : memref<1x1x1x1xf32, #tpu.memory_space<vmem>>, vector<1x1x1x1xf32>,
    } else {
    }
    return
  }
  func.func @transform_0(%arg0: i32, %arg1: i32, %arg2: i32) -> (i32, i32, i32) {
    %c1_i32 = arith.constant 1 : i32
    %0 = arith.muli %arg1, %c1_i32 : i32
    %1 = arith.addi %0, %arg2 : i32
    %c0_i32 = arith.constant 0 : i32
    %2 = arith.minsi %1, %c0_i32 : i32
    %c0_i32_0 = arith.constant 0 : i32
    %c0_i32_1 = arith.constant 0 : i32
    return %arg0, %c0_i32_0, %2 : i32, i32, i32
  }
  func.func @transform_1(%arg0: i32, %arg1: i32, %arg2: i32) -> (i32, i32, i32) {
    %c1_i32 = arith.constant 1 : i32
    %0 = arith.muli %arg1, %c1_i32 : i32
    %1 = arith.addi %0, %arg2 : i32
    %c0_i32 = arith.constant 0 : i32
    %2 = arith.minsi %1, %c0_i32 : i32
    %c0_i32_0 = arith.constant 0 : i32
    %c0_i32_1 = arith.constant 0 : i32
    return %arg0, %c0_i32_0, %2 : i32, i32, i32
  }
  func.func @transform_2(%arg0: i32, %arg1: i32, %arg2: i32) -> (i32, i32, i32, i32) {
    %c0_i32 = arith.constant 0 : i32
    %c0_i32_0 = arith.constant 0 : i32
    %c0_i32_1 = arith.constant 0 : i32
    return %arg0, %arg1, %c0_i32, %c0_i32_0 : i32, i32, i32, i32
  }
  func.func @transform_3(%arg0: i32, %arg1: i32, %arg2: i32) -> (i32, i32, i32, i32) {
    %c0_i32 = arith.constant 0 : i32
    %c0_i32_0 = arith.constant 0 : i32
    %c0_i32_1 = arith.constant 0 : i32
    return %arg0, %arg1, %c0_i32, %c0_i32_0 : i32, i32, i32, i32
  }
}

</mosaic_0001>

<bundles_post_ra>
// kernel: tpu_custom_call.1
= control target key start
LH: loop header
LB: loop body
LE: loop exit
PB: predicated region body
PF: predicated region fallthrough
CT: control target
= control target key end

     0   :  { %9 = vsyncpa [#allocation5], 0  ;;  %s1132_s0 = inlined_call_operand.hbm [shape: f32[2,4,256], index: 0, kind: input, shape index: {}]   ;;  %s1133_s1 = inlined_call_operand.hbm [shape: s32[2,1,256], index: 1, kind: input, shape index: {}]   ;;  %s1134_s2 = inlined_call_operand.vmem [shape: f32[2,1,1,1], index: 2, kind: output, shape index: {0}]   ;;  %s1135_s3 = inlined_call_operand.vmem [shape: f32[2,1,1,1], index: 3, kind: output, shape index: {1}]  }
   0x1   :  { %11 = vsyncpa [#allocation5 + $0x1], 0 }
   0x2   :  { %12 = vsyncpa [#allocation7], 0 }
   0x3   :  { %14 = vsyncpa [#allocation7 + $0x1], 0  ;;  %s926_s12 = smov 0   ;;  %s928_s13 = smov 0  }
   0x4   :  { %s930_s14 = smov 0   ;;  %s932_s15 = smov 0  }
   0x5   :  { %s934_s16 = smov 0   ;;  %s936_s17 = smov 0  }
   0x6 LB: > { %s694_s18 = sadd.s32 4294967295, %s900_s17   ;;  %s39_s19 = sadd.s32 1, %s896_s16  ;;  %s900_s17 = sphi %s936_s17, %s20_s17   ;;  %s896_s16 = sphi %s934_s16, %s1151_s16   ;;  %s892_s15 = sphi %s932_s15, %s1150_s15   ;;  %s888_s14 = sphi %s930_s14, %s1149_s14   ;;  %s884_s13 = sphi %s928_s13, %s1148_s13   ;;  %s880_s12 = sphi %s926_s12, %s1147_s12  }
   0x7   : > { %p41_p0 = scmp.ge.s32.totalorder %s39_s19, 2  ;;  %s54_s20 = sadd.s32 1, %s888_s14 }
   0x8   : > { %p61_p1 = scmp.ne.s32.totalorder %s888_s14, %s884_s13  ;;  %p62_p2 = scmp.eq.s32.totalorder %s900_s17, 0 }
   0x9   : > { %s1153_s19 = smov (%p41_p0, %s39_s19), 0  ;;  %p67_p4 = scmp.ne.s32.totalorder %s884_s13, %s880_s12 }
   0xa   : > { %p962_p3 = por %p62_p2, %p61_p1  ;;  %s49_s22 = ssub.s32 %s896_s16, %s1153_s19 }
   0xb   : > { %p68_p5 = scmp.eq.s32.totalorder %s694_s18, 0  ;;  %p52_p6 = scmp.eq.s32.totalorder %s49_s22, 0 }
   0xc   : > { %p728_p8 = scmp.lt.s32.totalorder %s900_s17, 2  ;;  %s978_s25 = sand.u32 1, %s888_s14  }
   0xd   : > { %p969_p7 = por %p68_p5, %p67_p4  ;;  %s711_s26 = sshll.u32 %s896_s16, 7 }
   0xe   : > { %s975_s24 = scalar_select %p52_p6, %s888_s14, %s54_s20  }
   0xf   : > { %s1138_s23 = scalar_select %p969_p7, 1, 0 }
  0x10   : > { %s698_s27 = sshll.u32 %s978_s25, 3  ;;  %s985_s30 = scalar_lea.hbm %s1132_s0, %s711_s26 }
  0x11   : > { %s185_s4 = scalar_lea.vmem [#allocation4], %s698_s27  ;;  %p989_p9 = pnand %p728_p8, %p962_p3 }
  0x12   : > { %s198_s5 = sshll.u32 %s185_s4, 4  ;;  %s182_s7 = scalar_lea.sflag [#allocation5], %s978_s25  ;;  %s993_s5 = int_to_ptr.vmem [resolvable:$true] %s198_s5 }
  0x13   : > { %s786_s8 = scalar_lea.hbm %s985_s30, 128  ;;  %p788_p13 = pneg %p989_p9 }
  0x14   : > { %p787_p12 = scmp.ne.s32.totalorder %s985_s30, %s786_s8  ;;  %s791_s11 = scalar_lea.hbm %s1132_s0, 256 }
  0x15   : > { %p792_p2 = scmp.lt.u32.totalorder %s985_s30, %s1132_s0  ;;  %p793_p3 = scmp.lt.u32.totalorder %s791_s11, %s786_s8 }
  0x16   : > { %p789_p0 = pnand %p788_p13, %p787_p12  ;;  %p795_p5 = scmp.lt.u32.totalorder %s786_s8, %s985_s30 }
  0x17   : > { %p794_p4 = por %p793_p3, %p792_p2 }
  0x18   : > { %p790_p1 = pneg %p789_p0 }
  0x19   : > { %p796_p6 = por %p795_p5, %p794_p4 }
  0x1b   : > { %p797_p8 = pnand %p796_p6, %p790_p1 }
  0x1d   : > { %800 = shalt.err (!%p797_p8)
}
  0x1e   : > { %s801_s20 = scalar_lea.vmem %s993_s5, 128  ;;  %s902_s21 = smov [#allocation4]  }
  0x1f   : > { %p802_p12 = scmp.ne.s32.totalorder %s993_s5, %s801_s20  ;;  %s806_s22 = sshll.u32 %s902_s21, 4  ;;  %s807_s22 = int_to_ptr.vmem [resolvable:$false] %s806_s22 }
  0x20   : > { %s808_s26 = scalar_lea.vmem %s807_s22, 256  ;;  %p809_p11 = scmp.lt.s32.totalorder %s993_s5, %s807_s22 }
  0x21   : > { %p804_p0 = pnand %p802_p12, %p788_p13  ;;  %p810_p2 = scmp.lt.s32.totalorder %s808_s26, %s801_s20 }
  0x23   : > { %p805_p10 = pneg %p804_p0  ;;  %p811_p3 = por %p810_p2, %p809_p11 }
  0x25   : > { %p812_p4 = pnand %p811_p3, %p805_p10 }
  0x27   : > { %815 = shalt.err (!%p812_p4)
}
  0x28   : > { %724 = dma.hbm_to_vmem [thread:$0]  (!%p989_p9), %s985_s30, 128, %s993_s5, %s182_s7  }
  0x29   : > { %p1140_p1 = scmp.lt.s32.totalorder %s900_s17, 3  ;;  %p1141_p5 = scmp.ge.s32.totalorder %s900_s17, 1 }
  0x2a   : > { %s701_s28 = sshll.u32 %s978_s25, 1  ;;  %s712_s29 = sshll.u32 %s896_s16, 5 }
  0x2b   : > { %p1027_p6 = pnand %p1141_p5, %p1140_p1  ;;  %s1036_s9 = scalar_lea.hbm %s1133_s1, %s712_s29 }
  0x2c   : > { %s209_s10 = scalar_lea.vmem [#allocation6], %s701_s28  ;;  %s206_s30 = scalar_lea.sflag [#allocation7], %s978_s25 }
  0x2d   : > { %s1142_s27 = scalar_select %p1027_p6, 1, 0 }
  0x2e   : > { %s222_s11 = sshll.u32 %s209_s10, 4  ;;  %s816_s5 = scalar_lea.hbm %s1036_s9, 32  ;;  %s223_s11 = int_to_ptr.vmem [resolvable:$true] %s222_s11 }
  0x2f   : > { %p817_p10 = scmp.ne.s32.totalorder %s1036_s9, %s816_s5  ;;  %s821_s18 = scalar_lea.hbm %s1133_s1, 64 }
  0x30   : > { %p822_p12 = scmp.lt.u32.totalorder %s1036_s9, %s1133_s1  ;;  %p823_p0 = scmp.lt.u32.totalorder %s821_s18, %s816_s5 }
  0x31   : > { %p819_p11 = pnand %p817_p10, %p788_p13  ;;  %p825_p3 = scmp.lt.u32.totalorder %s816_s5, %s1036_s9 }
  0x32   : > { %p824_p2 = por %p823_p0, %p822_p12 }
  0x33   : > { %p820_p8 = pneg %p819_p11 }
  0x34   : > { %p826_p4 = por %p825_p3, %p824_p2 }
  0x36   : > { %p827_p1 = pnand %p826_p4, %p820_p8 }
  0x38   : > { %830 = shalt.err (!%p827_p1)
}
  0x39   : > { %s831_s25 = scalar_lea.vmem %s223_s11, 32  ;;  %s903_s22 = smov [#allocation6]  }
  0x3a   : > { %p832_p5 = scmp.ne.s32.totalorder %s223_s11, %s831_s25  ;;  %s836_s26 = sshll.u32 %s903_s22, 4  ;;  %s837_s26 = int_to_ptr.vmem [resolvable:$false] %s836_s26 }
  0x3b   : > { %s838_s28 = scalar_lea.vmem %s837_s26, 64  ;;  %p839_p7 = scmp.lt.s32.totalorder %s223_s11, %s837_s26 }
  0x3c   : > { %p834_p10 = pnand %p832_p5, %p788_p13  ;;  %p840_p6 = scmp.lt.s32.totalorder %s838_s28, %s831_s25 }
  0x3e   : > { %p835_p11 = pneg %p834_p10  ;;  %p841_p0 = por %p840_p6, %p839_p7 }
  0x40   : > { %p842_p12 = pnand %p841_p0, %p835_p11 }
  0x42   : > { %845 = shalt.err (!%p842_p12)
}
  0x43   : > { %727 = dma.hbm_to_vmem [thread:$0]  (!%p989_p9), %s1036_s9, 32, %s223_s11, %s206_s30  }
  0x44   : > { %p1143_p8 = scmp.ne.s32.totalorder %s1142_s27, 0 }
  0x45   : > { %s233_s29 = sand.u32 (!%p1143_p8), 1, %s884_s13   ;;  %p1144_p13 = scmp.ne.s32.totalorder (!%p1143_p8), %s1138_s23, 0 }
  0x46   : > { %231 = sbr.rel (%p1143_p8) target bundleno = 376 (0x178), region = 28  ;;  %s705_s4 = sshll.u32 (!%p1143_p8), %s233_s29, 3 }
  0x47   : > { %s234_s8 = scalar_lea.sflag (!%p1143_p8), [#allocation5], %s233_s29  ;;  %s237_s10 = scalar_lea.vmem (!%p1143_p8), [#allocation4], %s705_s4 }
  0x4d   : > { %871 = dma.done.wait (%p1144_p13), %s234_s8, 128  }
  0x4e   : > { %873 = vsyncadd (%p1144_p13), %s234_s8, 4294967168  ;;  %s706_s5 = sshll.u32 %s233_s29, 1  ;;  %s243_s7 = scalar_lea.sflag [#allocation7], %s233_s29 }
  0x4f   : > { %s246_s6 = scalar_lea.vmem [#allocation6], %s706_s5 }
  0x50   : > { %875 = dma.done.wait (%p1144_p13), %s243_s7, 32  }
  0x51   : > { %877 = vsyncadd (%p1144_p13), %s243_s7, 4294967264  ;;  %v307_v0 = vlaneseq  ;;  %v904_v2 = vmov 0.0   ;;  %vm318_vm1 = vcmask 1043456   ;;  %v313_v3 = vld [vmem:[%s237_s10] sm:$0xff]  ;;  %v1077_v4 = vld [vmem:[%s246_s6] sm:$0x3] }
  0x52   : > { %v316_v5 = vcombine.high %v313_v3, %v313_v3  ;;  %v319_v6 = vsel %vm318_vm1, %v313_v3, -inf  ;;  %vm394_vm2 = vcmp.ne.s32.totalorder %v1077_v4, 255  ;;  %v905_v62 = vmov 1966171168   ;;  %p289_p7 = scmp.lt.s32.totalorder %s892_s15, 1 }
  0x53   : > { %vm1069_vm0 = vcmp.lt.s32.totalorder %v307_v0, 256  ;;  %v320_v7 = vrot.slane %v319_v6, 4  ;;  %v707_v10 = vsel %vm394_vm2, 1.0, %v904_v2  ;;  %v362_v23 = vshrl.u32 %v307_v0, 7 }
  0x54   : > { %311 = vst.msk [vmem:[#allocation2] sm:$0x3] %vm1069_vm0, %v904_v2  ;;  %312 = vst.msk [vmem:[#allocation3] sm:$0x3] %vm1069_vm0, %v904_v2  ;;  %v326_v8 = vsel %vm318_vm1, %v316_v5, -inf  ;;  %v405_v63 = vunpack.c.l.s4 %v905_v62  ;;  %vm508_vm5 = vcmask 1040384  }
  0x55   : > { %v321_v11 = vmax.f32 %v319_v6, %v320_v7  ;;  %v327_v12 = vrot.slane %v326_v8, 4  ;;  %v1086_v26 = vsub.s32 0, %v362_v23  ;;  %v1088_v28 = vsub.s32 1, %v362_v23  ;;  %s1155_s15 = smov (!%p289_p7, %s892_s15), 1 }
  0x56   : > { %v406_v6 = vunpack.c.0.s8 %v405_v63  ;;  %s294_s9 = scalar_lea.vmem %s1134_s2, %s1155_s15  ;;  %vm522_vm6 = vcmask 0   ;;  %s300_s18 = scalar_lea.vmem %s1135_s3, %s1155_s15 }
  0x57   : > { %v322_v14 = vrot.slane %v321_v11, 2  ;;  %v328_v15 = vmax.f32 %v326_v8, %v327_v12  ;;  %v366_v29 = vrot.slane %v1077_v4, %v1086_v26  ;;  %v370_v30 = vrot.slane %v1077_v4, %v1088_v28 }
  0x59   : > { %v323_v16 = vmax.f32 %v321_v11, %v322_v14  ;;  %v329_v17 = vrot.slane %v328_v15, 2  ;;  %vm371_vm3 = vcmp.eq.s32.totalorder %v362_v23, %v366_v29  ;;  %vm372_vm4 = vcmp.eq.s32.totalorder %v362_v23, %v370_v30 }
  0x5a   : > { %v409_v11 = vsub.s32 %v406_v6, %v362_v23 }
  0x5b   : > { %v426_v9 = vld [vmem:[#allocation3] sm:$0x3]  ;;  %v324_v18 = vrot.slane %v323_v16, 1  ;;  %v330_v19 = vmax.f32 %v328_v15, %v329_v17  ;;  %v400_v14 = vld [vmem:[#allocation2] sm:$0x3] }
  0x5c   : > { %v429_v13 = vadd.f32 %v707_v10, %v426_v9 }
  0x5d   : > { %v325_v20 = vmax.f32 %v323_v16, %v324_v18  ;;  %v331_v21 = vrot.slane %v330_v19, 1 }
  0x5e   : > { %430 = vst.msk [vmem:[#allocation3] sm:$0x3] %vm1069_vm0, %v429_v13 }
  0x5f   : > { %v332_v22 = vmax.f32 %v330_v19, %v331_v21 }
  0x61   : > { %v335_v24 = vcombine.low %v325_v20, %v332_v22 }
  0x63   : > { %v337_v25 = vsub.f32 %v313_v3, %v335_v24 }
  0x65   : > { %v338_v27 = vmul.f32 1.442695, %v337_v25  ;;  %v374_v31 = vcombine.high %v337_v25, %v337_v25  ;;  %v376_v32 = vsel %vm371_vm3, %v337_v25, 0.0  ;;  %v524_v18 = vld [vmem:[#allocation3] sm:$0x3] }
  0x66   : > { %v378_v35 = vsel %vm318_vm1, %v376_v32, 0.0  ;;  %v529_v19 = vrot.slane %v524_v18, %v1086_v26  ;;  %v533_v20 = vrot.slane %v524_v18, %v1088_v28 }
  0x67   : > { %780 = vpow2.f32 %v338_v27  ;;  %v377_v33 = vsel %vm372_vm4, %v374_v31, 0.0  ;;  %v379_v41 = vrot.slane %v378_v35, 4 }
  0x68   : > { %v385_v39 = vsel %vm318_vm1, %v377_v33, 0.0  ;;  %v536_v27 = vsel %vm508_vm5, %v529_v19, 0.0  ;;  %v537_v4 = vsel %vm508_vm5, %v533_v20, 0.0 }
  0x69   : > { %v386_v44 = vrot.slane %v385_v39, 4  ;;  %v380_v47 = vadd.f32 %v379_v41, %v378_v35  ;;  %v538_v30 = vadd.f32 %v537_v4, %v536_v27 }
  0x6b   : > { %v387_v50 = vadd.f32 %v386_v44, %v385_v39  ;;  %v381_v53 = vrot.slane %v380_v47, 2 }
  0x6d   : > { %v388_v56 = vrot.slane %v387_v50, 2  ;;  %v382_v58 = vadd.f32 %v381_v53, %v380_v47 }
  0x6f   : > { %v389_v59 = vadd.f32 %v388_v56, %v387_v50  ;;  %v383_v60 = vrot.slane %v382_v58, 1 }
  0x71   : > { %v781_v34 = vpop.eup %780  ;;  %v390_v61 = vrot.slane %v389_v59, 1  ;;  %v384_v0 = vadd.f32 %v383_v60, %v382_v58 }
  0x72   : > { %v341_v36 = vcombine.high %v781_v34, %v781_v34  ;;  %v343_v37 = vsel %vm318_vm1, %v781_v34, 0.0 }
  0x73   : > { %v344_v38 = vrot.slane %v343_v37, 4  ;;  %v391_v5 = vadd.f32 %v390_v61, %v389_v59 }
  0x74   : > { %v350_v40 = vsel %vm318_vm1, %v341_v36, 0.0 }
  0x75   : > { %v345_v42 = vadd.f32 %v344_v38, %v343_v37  ;;  %v351_v43 = vrot.slane %v350_v40, 4 }
  0x77   : > { %v346_v45 = vrot.slane %v345_v42, 2  ;;  %v352_v46 = vadd.f32 %v351_v43, %v350_v40 }
  0x79   : > { %v347_v48 = vadd.f32 %v346_v45, %v345_v42  ;;  %v353_v49 = vrot.slane %v352_v46, 2 }
  0x7b   : > { %v348_v51 = vrot.slane %v347_v48, 1  ;;  %v354_v52 = vadd.f32 %v353_v49, %v352_v46 }
  0x7d   : > { %v349_v54 = vadd.f32 %v348_v51, %v347_v48  ;;  %v355_v55 = vrot.slane %v354_v52, 1 }
  0x7f   : > { %v356_v57 = vadd.f32 %v355_v55, %v354_v52  ;;  %782 = vlog2.f32 %v349_v54 }
  0x81   : > { %784 = vlog2.f32 %v356_v57 }
  0x89   : > { %v783_v2 = vpop.eup %782 }
  0x8a   : > { %v358_v3 = vmul.f32 0.6931472, %v783_v2 }
  0x8b   : > { %v785_v7 = vpop.eup %784 }
  0x8c   : > { %v360_v8 = vmul.f32 0.6931472, %v785_v7  ;;  %v392_v9 = vsub.f32 %v358_v3, %v384_v0 }
  0x8e   : > { %v393_v10 = vsub.f32 %v360_v8, %v391_v5 }
  0x90   : > { %v403_v12 = vcombine.low %v392_v9, %v393_v10 }
  0x92   : > { %v410_v13 = vrot.slane %v403_v12, %v409_v11 }
  0x94   : > { %v417_v15 = vrot.slane %v410_v13, %v409_v11 }
  0x96   : > { %v419_v16 = vsel %vm394_vm2, %v417_v15, 0.0 }
  0x97   : > { %v420_v17 = vadd.f32 %v419_v16, %v400_v14 }
  0x99   : > { %425 = vst.msk [vmem:[#allocation2] sm:$0x3] %vm1069_vm0, %v420_v17 }
  0xa0   : > { %v496_v21 = vld [vmem:[#allocation2] sm:$0x3] }
  0xa1   : > { %v501_v22 = vrot.slane %v496_v21, %v1086_v26  ;;  %v505_v23 = vrot.slane %v496_v21, %v1088_v28 }
  0xa3   : > { %v509_v24 = vsel %vm508_vm5, %v501_v22, 0.0  ;;  %v510_v25 = vsel %vm508_vm5, %v505_v23, 0.0 }
  0xa4   : > { %v511_v29 = vadd.f32 %v510_v25, %v509_v24 }
  0xa6   : > { %512 = vadd.xlane.f32.xlu0 %v511_v29 }
  0xaa   : > { %539 = vadd.xlane.f32.xlu0 %v538_v30 }
 0x133   : > { %v513_v1 = vpop.xlane.xlu0 %512 }
 0x134   : > { %v514_v31 = vrot.slane %v513_v1, 4 }
 0x136   : > { %v515_v32 = vadd.f32 %v514_v31, %v513_v1 }
 0x137   : > { %v540_v33 = vpop.xlane.xlu0 %539 }
 0x138   : > { %v516_v34 = vrot.slane %v515_v32, 2  ;;  %v541_v35 = vrot.slane %v540_v33, 4 }
 0x13a   : > { %v542_v36 = vadd.f32 %v541_v35, %v540_v33  ;;  %v517_v26 = vadd.f32 %v516_v34, %v515_v32 }
 0x13c   : > { %v543_v37 = vrot.slane %v542_v36, 2  ;;  %v518_v28 = vrot.slane %v517_v26, 1 }
 0x13e   : > { %v544_v38 = vadd.f32 %v543_v37, %v542_v36  ;;  %v519_v39 = vadd.f32 %v518_v28, %v517_v26 }
 0x140   : > { %713 = vpush %v519_v39  ;;  %v545_v40 = vrot.slane %v544_v38, 1 }
 0x142   : > { %v546_v41 = vadd.f32 %v545_v40, %v544_v38 }
 0x144   : > { %715 = vpush %v546_v41 }
 0x171   : > { %s714_s11 = spop %713 }
 0x172   : > { %v521_v42 = vstv %s714_s11 }
 0x173   : > { %523 = vst.msk [vmem:[%s294_s9] sm:$0x1] %vm522_vm6, %v521_v42 }
 0x175   : > { %s716_s20 = spop %715 }
 0x176   : > { %v548_v43 = vstv %s716_s20 }
 0x177   : > { %549 = vst.msk [vmem:[%s300_s18] sm:$0x1] %vm522_vm6, %v548_v43 }
 0x178 PF: > { %s20_s17 = sadd.s32 1, %s900_s17   ;;  %s1147_s12 = smov %s884_s13 }
 0x179   : > { %p17_p9 = scmp.ge.s32.totalorder %s20_s17, 4   ;;  %s1148_s13 = smov %s888_s14 }
 0x17a   : > { %s1149_s14 = smov %s975_s24  ;;  %s1150_s15 = smov %s896_s16 }
 0x17b   : > { %s1151_s16 = smov %s1153_s19  ;;  %19 = sbr.rel (!%p17_p9) target bundleno = 6 (0x6), region = 109 }
 0x182   :  { %591 = vsyncpa [#allocation5], 1 }
 0x183   :  { %593 = vsyncpa [#allocation5 + $0x1], 1 }
 0x184   :  { %594 = vsyncpa [#allocation7], 1 }
 0x185   :  { %596 = vsyncpa [#allocation7 + $0x1], 1 }

</bundles_post_ra>
